<compile_context>
chip_gen: v7x
topology: tpu7x:2x2x1
jax: 0.10.0
libtpu: 0.0.40
codegen_flags: <defaults>
</compile_context>

<pallas_src>
import functools

import jax
import jax.numpy as jnp
from jax.experimental import pallas as pl
from jax.experimental.pallas import tpu as pltpu


def _round_up(n, m):
    return ((n + m - 1) // m) * m


def _choose_tm(M, tm):
    """Pick the batch tile.

    Small batches -> a single minimal tile (sublane multiple).  Larger batches
    -> big tiles (amortize the ~0.35us per-step overhead) but split so the
    grid has >= 2 steps, letting v7x's two TensorCores share the 'parallel'
    batch axis.
    """
    if M <= 128:
        return max(8, _round_up(M, 8))
    half = _round_up(-(-M // 2), 128)
    return max(128, min(tm, half))


# ------------------------------------------------------------------ kernel ----
def _make_mlp_kernel(n_layers):
    """Fused kernel: refs = (x, W1, b1, ..., Wn, bn, out)."""
    def kernel(*refs):
        x_ref = refs[0]
        out_ref = refs[-1]
        h = x_ref[...]                                    # bf16 (tm, D)
        for l in range(n_layers):
            w = refs[1 + 2 * l][...]                      # bf16 (din, dout)
            b = refs[2 + 2 * l][...]                      # f32  (1, dout)
            # bf16 operands, f32 accumulation on the MXU; f32 epilogue.
            h = jnp.dot(h.astype(jnp.bfloat16), w,
                        preferred_element_type=jnp.float32) + b
            if l < n_layers - 1:                          # ReLU on all but last
                h = jnp.maximum(h, 0.0)
        out_ref[...] = h.astype(out_ref.dtype)
    return kernel


# ----------------------------------------------------------------- wrapper ----
@functools.partial(jax.jit, static_argnames=("tm",))
def mlp_forward(x, params, *, tm=512):
    """x: (B, ...).  params: tuple of (W (in,out), b (out,)) per layer."""
    B = x.shape[0]
    xf = x.reshape(B, -1).astype(jnp.bfloat16)            # x.view(x.size(0), -1)
    M, D = xf.shape
    n_layers = len(params)
    out_dim = params[-1][0].shape[1]

    tm = _choose_tm(M, tm)
    grid = (pl.cdiv(M, tm),)                               # ragged last block OK

    in_specs = [pl.BlockSpec((tm, D), lambda i: (i, 0))]    # streamed batch tile
    flat_args = [xf]
    w_bytes = 0
    flops = 0
    for (w, b) in params:
        din, dout = w.shape
        # Resident across the whole grid (constant index_map -> fetched once).
        in_specs.append(pl.BlockSpec((din, dout), lambda i: (0, 0)))
        in_specs.append(pl.BlockSpec((1, dout), lambda i: (0, 0)))
        flat_args.append(w.astype(jnp.bfloat16))
        flat_args.append(b.reshape(1, dout).astype(jnp.float32))
        w_bytes += din * dout * 2 + dout * 4
        flops += 2 * M * din * dout

    bytes_accessed = M * D * 2 + w_bytes + M * out_dim * 4
    cost = pl.CostEstimate(flops=flops, transcendentals=0,
                           bytes_accessed=bytes_accessed)

    # Rough VMEM need: double-buffered bf16 x tile + resident weights (double
    # buffered by default) + double-buffered f32 out tile + f32 intermediates.
    max_dim = max(D, max(w.shape[1] for w, _ in params))
    vmem_est = (2 * tm * D * 2
                + 2 * w_bytes
                + 2 * tm * out_dim * 4
                + 4 * tm * max_dim * 4)
    vmem_limit = int(min(100 << 20, max(32 << 20, 2 * vmem_est)))

    out = pl.pallas_call(
        _make_mlp_kernel(n_layers),
        out_shape=jax.ShapeDtypeStruct((M, out_dim), jnp.float32),
        grid=grid,
        in_specs=in_specs,
        out_specs=pl.BlockSpec((tm, out_dim), lambda i: (i, 0)),
        compiler_params=pltpu.CompilerParams(
            dimension_semantics=("parallel",),
            vmem_limit_bytes=vmem_limit),
        cost_estimate=cost,
    )(*flat_args)
    return out


# -------------------------------------------------------------------- main ----
if __name__ == "__main__":
    key = jax.random.PRNGKey(0)
    keys = jax.random.split(key, 7)
    kx, kp = keys[0], keys[1:]

    # MLP(input_dim=4*16*16, output_dim=128, dim=256, n_blk=3, norm='none', activ='relu')
    N, C, H, W = 2, 4, 16, 16
    input_dim, dim, output_dim, n_blk = C * H * W, 256, 128, 3

    dims = [input_dim] + [dim] * (n_blk - 1) + [output_dim]
    # Weights stored (in, out) == PyTorch nn.Linear weight.T; y = x @ W + b.
    params = tuple(
        (0.1 * jax.random.normal(kp[2 * l], (dims[l], dims[l + 1]), jnp.float32),
         0.1 * jax.random.normal(kp[2 * l + 1], (dims[l + 1],), jnp.float32))
        for l in range(n_blk))

    x = jax.random.normal(kx, (N, C, H, W), jnp.float32)

    y = mlp_forward(x, params)
    jax.block_until_ready(y)

    # ---- pure-JAX reference with matching bf16-operand / f32-accum matmuls ----
    h = x.reshape(N, -1)
    for l, (w, b) in enumerate(params):
        h = jnp.dot(h.astype(jnp.bfloat16), w.astype(jnp.bfloat16),
                    preferred_element_type=jnp.float32) + b
        if l < n_blk - 1:
            h = jnp.maximum(h, 0.0)

    assert y.shape == (N, output_dim), y.shape
    assert jnp.allclose(y, h, rtol=2e-2, atol=2e-2), float(jnp.max(jnp.abs(y - h)))

    print("KERNEL_OK")
</pallas_src>

<mosaic_0001>
module attributes {stable_mosaic.version = 11 : i64} {
  func.func @kernel(%arg0: i32, %arg1: memref<8x1024xbf16, #tpu.memory_space<vmem>>, %arg2: memref<1024x256xbf16, #tpu.memory_space<vmem>>, %arg3: memref<1x256xf32, #tpu.memory_space<vmem>>, %arg4: memref<256x256xbf16, #tpu.memory_space<vmem>>, %arg5: memref<1x256xf32, #tpu.memory_space<vmem>>, %arg6: memref<256x128xbf16, #tpu.memory_space<vmem>>, %arg7: memref<1x128xf32, #tpu.memory_space<vmem>>, %arg8: memref<8x128xf32, #tpu.memory_space<vmem>>) attributes {dimension_semantics = [#tpu.dimension_semantics<parallel>], iteration_bounds = array<i64: 1>, scalar_prefetch = 0 : i64, scratch_operands = 0 : i64, tpu.core_type = #tpu.core_type<tc>, window_params = [{transform_indices = @transform_0, window_bounds = array<i64: 8, 1024>}, {pipeline_mode = #tpu.pipeline_mode<synchronous>, transform_indices = @transform_1, window_bounds = array<i64: 1024, 256>}, {pipeline_mode = #tpu.pipeline_mode<synchronous>, transform_indices = @transform_2, window_bounds = array<i64: 1, 256>}, {pipeline_mode = #tpu.pipeline_mode<synchronous>, transform_indices = @transform_3, window_bounds = array<i64: 256, 256>}, {pipeline_mode = #tpu.pipeline_mode<synchronous>, transform_indices = @transform_4, window_bounds = array<i64: 1, 256>}, {pipeline_mode = #tpu.pipeline_mode<synchronous>, transform_indices = @transform_5, window_bounds = array<i64: 256, 128>}, {pipeline_mode = #tpu.pipeline_mode<synchronous>, transform_indices = @transform_6, window_bounds = array<i64: 1, 128>}, {transform_indices = @transform_7, window_bounds = array<i64: 8, 128>}]} {
    %c0 = arith.constant 0 : index
    %c0_0 = arith.constant 0 : index
    %0 = vector.load %arg1[%c0, %c0_0] : memref<8x1024xbf16, #tpu.memory_space<vmem>>, vector<8x1024xbf16>
    %c0_1 = arith.constant 0 : index
    %c0_2 = arith.constant 0 : index
    %1 = vector.load %arg2[%c0_1, %c0_2] : memref<1024x256xbf16, #tpu.memory_space<vmem>>, vector<1024x256xbf16>
    %c0_3 = arith.constant 0 : index
    %c0_4 = arith.constant 0 : index
    %2 = vector.load %arg3[%c0_3, %c0_4] : memref<1x256xf32, #tpu.memory_space<vmem>>, vector<1x256xf32>
    %cst = arith.constant dense<0.000000e+00> : vector<8x256xf32>
    %3 = tpu.matmul %0, %1, %cst {dimension_numbers = #tpu.dot_dimension_numbers<[1], [0], [0], [1], [0, 0, 1, 1], [], []>} : vector<8x1024xbf16>, vector<1024x256xbf16>, vector<8x256xf32> -> vector<8x256xf32>
    %4 = vector.broadcast %2 : vector<1x256xf32> to vector<8x256xf32>
    %5 = arith.addf %3, %4 : vector<8x256xf32>
    %cst_5 = arith.constant 0.000000e+00 : f32
    %6 = vector.broadcast %cst_5 : f32 to vector<8x256xf32>
    %7 = arith.maximumf %5, %6 : vector<8x256xf32>
    %c0_6 = arith.constant 0 : index
    %c0_7 = arith.constant 0 : index
    %8 = vector.load %arg4[%c0_6, %c0_7] : memref<256x256xbf16, #tpu.memory_space<vmem>>, vector<256x256xbf16>
    %c0_8 = arith.constant 0 : index
    %c0_9 = arith.constant 0 : index
    %9 = vector.load %arg5[%c0_8, %c0_9] : memref<1x256xf32, #tpu.memory_space<vmem>>, vector<1x256xf32>
    %10 = arith.truncf %7 : vector<8x256xf32> to vector<8x256xbf16>
    %cst_10 = arith.constant dense<0.000000e+00> : vector<8x256xf32>
    %11 = tpu.matmul %10, %8, %cst_10 {dimension_numbers = #tpu.dot_dimension_numbers<[1], [0], [0], [1], [0, 0, 1, 1], [], []>} : vector<8x256xbf16>, vector<256x256xbf16>, vector<8x256xf32> -> vector<8x256xf32>
    %12 = vector.broadcast %9 : vector<1x256xf32> to vector<8x256xf32>
    %13 = arith.addf %11, %12 : vector<8x256xf32>
    %cst_11 = arith.constant 0.000000e+00 : f32
    %14 = vector.broadcast %cst_11 : f32 to vector<8x256xf32>
    %15 = arith.maximumf %13, %14 : vector<8x256xf32>
    %c0_12 = arith.constant 0 : index
    %c0_13 = arith.constant 0 : index
    %16 = vector.load %arg6[%c0_12, %c0_13] : memref<256x128xbf16, #tpu.memory_space<vmem>>, vector<256x128xbf16>
    %c0_14 = arith.constant 0 : index
    %c0_15 = arith.constant 0 : index
    %17 = vector.load %arg7[%c0_14, %c0_15] : memref<1x128xf32, #tpu.memory_space<vmem>>, vector<1x128xf32>
    %18 = arith.truncf %15 : vector<8x256xf32> to vector<8x256xbf16>
    %cst_16 = arith.constant dense<0.000000e+00> : vector<8x128xf32>
    %19 = tpu.matmul %18, %16, %cst_16 {dimension_numbers = #tpu.dot_dimension_numbers<[1], [0], [0], [1], [0, 0, 1, 1], [], []>} : vector<8x256xbf16>, vector<256x128xbf16>, vector<8x128xf32> -> vector<8x128xf32>
    %20 = vector.broadcast %17 : vector<1x128xf32> to vector<8x128xf32>
    %21 = arith.addf %19, %20 : vector<8x128xf32>
    %c0_17 = arith.constant 0 : index
    %c0_18 = arith.constant 0 : index
    %22 = vector.load %arg8[%c0_17, %c0_18] : memref<8x128xf32, #tpu.memory_space<vmem>>, vector<8x128xf32>
    tpu.vector_store %arg8[%c0_17, %c0_18], %21 {strides = array<i32>} : memref<8x128xf32, #tpu.memory_space<vmem>>, vector<8x128xf32>,
    return
  }
  func.func @transform_0(%arg0: i32) -> (i32, i32) {
    %c0_i32 = arith.constant 0 : i32
    %c0_i32_0 = arith.constant 0 : i32
    return %arg0, %c0_i32 : i32, i32
  }
  func.func @transform_1(%arg0: i32) -> (i32, i32) {
    %c0_i32 = arith.constant 0 : i32
    %c0_i32_0 = arith.constant 0 : i32
    %c0_i32_1 = arith.constant 0 : i32
    return %c0_i32, %c0_i32_0 : i32, i32
  }
  func.func @transform_2(%arg0: i32) -> (i32, i32) {
    %c0_i32 = arith.constant 0 : i32
    %c0_i32_0 = arith.constant 0 : i32
    %c0_i32_1 = arith.constant 0 : i32
    return %c0_i32, %c0_i32_0 : i32, i32
  }
  func.func @transform_3(%arg0: i32) -> (i32, i32) {
    %c0_i32 = arith.constant 0 : i32
    %c0_i32_0 = arith.constant 0 : i32
    %c0_i32_1 = arith.constant 0 : i32
    return %c0_i32, %c0_i32_0 : i32, i32
  }
  func.func @transform_4(%arg0: i32) -> (i32, i32) {
    %c0_i32 = arith.constant 0 : i32
    %c0_i32_0 = arith.constant 0 : i32
    %c0_i32_1 = arith.constant 0 : i32
    return %c0_i32, %c0_i32_0 : i32, i32
  }
  func.func @transform_5(%arg0: i32) -> (i32, i32) {
    %c0_i32 = arith.constant 0 : i32
    %c0_i32_0 = arith.constant 0 : i32
    %c0_i32_1 = arith.constant 0 : i32
    return %c0_i32, %c0_i32_0 : i32, i32
  }
  func.func @transform_6(%arg0: i32) -> (i32, i32) {
    %c0_i32 = arith.constant 0 : i32
    %c0_i32_0 = arith.constant 0 : i32
    %c0_i32_1 = arith.constant 0 : i32
    return %c0_i32, %c0_i32_0 : i32, i32
  }
  func.func @transform_7(%arg0: i32) -> (i32, i32) {
    %c0_i32 = arith.constant 0 : i32
    %c0_i32_0 = arith.constant 0 : i32
    return %arg0, %c0_i32 : i32, i32
  }
}

</mosaic_0001>

<bundles_post_ra>
// kernel: mlp_forward.1
= control target key start
LH: loop header
LB: loop body
LE: loop exit
PB: predicated region body
PF: predicated region fallthrough
CT: control target
= control target key end

     0   :  { %v162_v9 = vlaneseq  ;;  %v2000_v10 = vmov 1966171168   ;;  %s2649_s0 = inlined_call_operand.vmem [shape: bf16[2,1024], index: 0, kind: input, shape index: {}]   ;;  %s2650_s1 = inlined_call_operand.vmem [shape: bf16[1024,256], index: 1, kind: input, shape index: {}]   ;;  %s2651_s2 = inlined_call_operand.vmem [shape: f32[1,256], index: 2, kind: input, shape index: {}]   ;;  %s2652_s3 = inlined_call_operand.vmem [shape: bf16[256,256], index: 3, kind: input, shape index: {}]   ;;  %s2653_s4 = inlined_call_operand.vmem [shape: f32[1,256], index: 4, kind: input, shape index: {}]   ;;  %s2654_s5 = inlined_call_operand.vmem [shape: bf16[256,128], index: 5, kind: input, shape index: {}]   ;;  %s2655_s6 = inlined_call_operand.vmem [shape: f32[1,128], index: 6, kind: input, shape index: {}]   ;;  %s2656_s7 = inlined_call_operand.hbm [shape: f32[2,128], index: 7, kind: output, shape index: {}]  }
   0x1   :  { %v1716_v0 = vld [vmem:[%s2650_s1 + $0x104] ss:$8 sps:$4 sm:$0xff]   ;;  %v1718_v1 = vld [vmem:[%s2650_s1 + $0x100] ss:$8 sps:$4 sm:$0xff]   ;;  %v1719_v2 = vld [vmem:[%s2650_s1 + $0x114] ss:$8 sps:$4 sm:$0xff]   ;;  %v181_v11 = vunpack.c.l.s4 %v2000_v10 }
   0x2   :  { %933 = vmatprep.subr.bf16.mxu0 %v1716_v0  ;;  %v1721_v3 = vld [vmem:[%s2650_s1 + $0x110] ss:$8 sps:$4 sm:$0xff]   ;;  %v1722_v4 = vld [vmem:[%s2650_s1 + $0x124] ss:$8 sps:$4 sm:$0xff]   ;;  %v1724_v5 = vld [vmem:[%s2650_s1 + $0x120] ss:$8 sps:$4 sm:$0xff]  }
   0x3   :  { %934 = vmatpush1.bf16.msra.mxu0 %v1718_v1  ;;  %v1725_v6 = vld [vmem:[%s2650_s1 + $0x134] ss:$8 sps:$4 sm:$0xff]   ;;  %v1727_v7 = vld [vmem:[%s2650_s1 + $0x130] ss:$8 sps:$4 sm:$0xff]   ;;  %v1728_v8 = vld [vmem:[%s2650_s1 + $0x144] ss:$8 sps:$4 sm:$0xff]   ;;  %v182_v15 = vunpack.c.0.s8 %v181_v11 }
   0x4   :  { %935 = vmatprep.subr.bf16.mxu0 %v1719_v2  ;;  %v1730_v12 = vld [vmem:[%s2650_s1 + $0x140] ss:$8 sps:$4 sm:$0xff]   ;;  %v1731_v13 = vld [vmem:[%s2650_s1 + $0x154] ss:$8 sps:$4 sm:$0xff]   ;;  %v2077_v14 = vshrl.u32 %v162_v9, 7 }
   0x5   :  { %v1733_v16 = vld [vmem:[%s2650_s1 + $0x150] ss:$8 sps:$4 sm:$0xff]   ;;  %v1734_v17 = vld [vmem:[%s2650_s1 + $0x164] ss:$8 sps:$4 sm:$0xff]   ;;  %v1736_v19 = vld [vmem:[%s2650_s1 + $0x160] ss:$8 sps:$4 sm:$0xff]  }
   0x6   :  { %v2086_v18 = vsub.s32 %v182_v15, %v2077_v14  ;;  %v28_v20 = vld [vmem:[%s2649_s0] sm:$0xff]  ;;  %v29_v21 = vld [vmem:[%s2649_s0 + $0x8] sm:$0xff]  ;;  %v30_v22 = vld [vmem:[%s2649_s0 + $0x10] sm:$0xff] }
   0x7   :  { %936 = vmatpush1.bf16.msra.mxu0 %v1721_v3  ;;  %v31_v23 = vld [vmem:[%s2649_s0 + $0x18] sm:$0xff]  ;;  %v1764_v24 = vld [vmem:[%s2649_s0] ss:$8 sps:$4 sm:$0xff]   ;;  %v177_v25 = vcombine.high %v28_v20, %v29_v21  ;;  %v1740_v36 = vld [vmem:[%s2650_s1 + $0x184] ss:$8 sps:$4 sm:$0xff]  }
   0x8   :  { %937 = vmatprep.subr.bf16.mxu0 %v1722_v4  ;;  %v1766_v26 = vld [vmem:[%s2649_s0 + $0x10] ss:$8 sps:$4 sm:$0xff]   ;;  %v179_v27 = vcombine.high %v30_v22, %v31_v23  ;;  %v1737_v28 = vld [vmem:[%s2650_s1 + $0x174] ss:$8 sps:$4 sm:$0xff]   ;;  %v186_v29 = vrot.slane %v1764_v24, %v2086_v18  ;;  %v1742_v39 = vld [vmem:[%s2650_s1 + $0x180] ss:$8 sps:$4 sm:$0xff]  }
   0x9   :  { %v2114_v30 = vrot.slane %v177_v25, %v2086_v18  ;;  %v200_v31 = vrot.slane %v1766_v26, %v2086_v18  ;;  %v1739_v33 = vld [vmem:[%s2650_s1 + $0x170] ss:$8 sps:$4 sm:$0xff]   ;;  %v1743_v41 = vld [vmem:[%s2650_s1 + $0x194] ss:$8 sps:$4 sm:$0xff]   ;;  %v1746_v43 = vld [vmem:[%s2650_s1 + $0x1a4] ss:$8 sps:$4 sm:$0xff]  }
   0xa   :  { %v2118_v32 = vrot.slane %v179_v27, %v2086_v18  ;;  %v1745_v42 = vld [vmem:[%s2650_s1 + $0x190] ss:$8 sps:$4 sm:$0xff]   ;;  %v1748_v44 = vld [vmem:[%s2650_s1 + $0x1a0] ss:$8 sps:$4 sm:$0xff]   ;;  %v1749_v45 = vld [vmem:[%s2650_s1 + $0x1b4] ss:$8 sps:$4 sm:$0xff]  }
   0xb   :  { %938 = vmatpush1.bf16.msra.mxu0 %v1724_v5  ;;  %v209_v34 = vcombine.high %v186_v29, %v200_v31  ;;  %v1751_v46 = vld [vmem:[%s2650_s1 + $0x1b0] ss:$8 sps:$4 sm:$0xff]   ;;  %v1752_v47 = vld [vmem:[%s2650_s1 + $0x1c4] ss:$8 sps:$4 sm:$0xff]  }
   0xc   :  { %939 = vmatprep.subr.bf16.mxu0 %v1725_v6  ;;  %v210_v35 = vcombine.low %v2114_v30, %v2118_v32 }
   0xd   :  { %v232_v37 = vrot.slane %v209_v34, %v2086_v18 }
   0xe   :  { %v2130_v38 = vrot.slane %v210_v35, %v2086_v18 }
   0xf   :  { %940 = vmatpush1.bf16.msra.mxu0 %v1727_v7  ;;  %v242_v40 = vcombine.high %v232_v37, %v232_v37  ;;  %924 = vmatprep.mubr.bf16.mxu1 %v232_v37 }
  0x10   :  { %941 = vmatprep.subr.bf16.mxu0 %v1728_v8 }
  0x11   :  { %965 = vmatprep.mubr.bf16.mxu0 %v242_v40 }
  0x13   :  { %942 = vmatpush1.bf16.msra.mxu0 %v1730_v12 }
  0x14   :  { %943 = vmatprep.subr.bf16.mxu0 %v1731_v13 }
  0x17   :  { %944 = vmatpush1.bf16.msra.mxu0 %v1733_v16 }
  0x18   :  { %945 = vmatprep.subr.bf16.mxu0 %v1734_v17 }
  0x1b   :  { %946 = vmatpush1.bf16.msra.mxu0 %v1736_v19 }
  0x1c   :  { %947 = vmatprep.subr.bf16.mxu0 %v1737_v28 }
  0x1f   :  { %948 = vmatpush1.bf16.msra.mxu0 %v1739_v33 }
  0x20   :  { %949 = vmatprep.subr.bf16.mxu0 %v1740_v36 }
  0x23   :  { %950 = vmatpush1.bf16.msra.mxu0 %v1742_v39 }
  0x24   :  { %951 = vmatprep.subr.bf16.mxu0 %v1743_v41 }
  0x27   :  { %952 = vmatpush1.bf16.msra.mxu0 %v1745_v42 }
  0x28   :  { %953 = vmatprep.subr.bf16.mxu0 %v1746_v43 }
  0x2b   :  { %954 = vmatpush1.bf16.msra.mxu0 %v1748_v44 }
  0x2c   :  { %12 = vsyncpa [#allocation3], 0  ;;  %955 = vmatprep.subr.bf16.mxu0 %v1749_v45  ;;  %v1813_v48 = vld [vmem:[%s2650_s1 + $0x4] ss:$8 sps:$4 sm:$0xff]   ;;  %v1815_v49 = vld [vmem:[%s2650_s1] ss:$8 sps:$4 sm:$0xff]   ;;  %v208_v59 = vcombine.low %v186_v29, %v200_v31  ;;  %v211_v2 = vcombine.high %v2114_v30, %v2118_v32 }
  0x2d   :  { %v1754_v50 = vld [vmem:[%s2650_s1 + $0x1c0] ss:$8 sps:$4 sm:$0xff]   ;;  %892 = vmatprep.subr.bf16.mxu1 %v1813_v48  ;;  %v1819_v51 = vld [vmem:[%s2650_s1 + $0x14] ss:$8 sps:$4 sm:$0xff]   ;;  %v1821_v52 = vld [vmem:[%s2650_s1 + $0x10] ss:$8 sps:$4 sm:$0xff]  }
  0x2e   :  { %893 = vmatpush1.bf16.msra.mxu1 %v1815_v49  ;;  %v1755_v53 = vld [vmem:[%s2650_s1 + $0x1d4] ss:$8 sps:$4 sm:$0xff]   ;;  %v1825_v54 = vld [vmem:[%s2650_s1 + $0x24] ss:$8 sps:$4 sm:$0xff]   ;;  %v1757_v55 = vld [vmem:[%s2650_s1 + $0x1d0] ss:$8 sps:$4 sm:$0xff]   ;;  %v2202_v0 = vrot.slane %v208_v59, %v2086_v18  ;;  %v2224_v8 = vrot.slane %v211_v2, %v2086_v18 }
  0x2f   :  { %956 = vmatpush1.bf16.msra.mxu0 %v1751_v46  ;;  %894 = vmatprep.subr.bf16.mxu1 %v1819_v51  ;;  %v1827_v56 = vld [vmem:[%s2650_s1 + $0x20] ss:$8 sps:$4 sm:$0xff]   ;;  %v1758_v57 = vld [vmem:[%s2650_s1 + $0x1e4] ss:$8 sps:$4 sm:$0xff]   ;;  %v1831_v58 = vld [vmem:[%s2650_s1 + $0x34] ss:$8 sps:$4 sm:$0xff]  }
  0x30   :  { %957 = vmatprep.subr.bf16.mxu0 %v1752_v47  ;;  %v1760_v60 = vld [vmem:[%s2650_s1 + $0x1e0] ss:$8 sps:$4 sm:$0xff]   ;;  %v1833_v61 = vld [vmem:[%s2650_s1 + $0x30] ss:$8 sps:$4 sm:$0xff]   ;;  %v1761_v62 = vld [vmem:[%s2650_s1 + $0x1f4] ss:$8 sps:$4 sm:$0xff]   ;;  %v240_v6 = vcombine.high %v2202_v0, %v2202_v0 }
  0x31   :  { %v1837_v63 = vld [vmem:[%s2650_s1 + $0x44] ss:$8 sps:$4 sm:$0xff]   ;;  %v1763_v1 = vld [vmem:[%s2650_s1 + $0x1f0] ss:$8 sps:$4 sm:$0xff]   ;;  %v1839_v3 = vld [vmem:[%s2650_s1 + $0x40] ss:$8 sps:$4 sm:$0xff]  }
  0x32   :  { %895 = vmatpush1.bf16.msra.mxu1 %v1821_v52  ;;  %v1770_v4 = vld [vmem:[%s2650_s1 + $0x204] ss:$8 sps:$4 sm:$0xff]   ;;  %v1843_v5 = vld [vmem:[%s2650_s1 + $0x54] ss:$8 sps:$4 sm:$0xff]   ;;  %v1768_v7 = vld [vmem:[%s2650_s1 + $0x200] ss:$8 sps:$4 sm:$0xff]  }
  0x33   :  { %958 = vmatpush1.bf16.msra.mxu0 %v1754_v50  ;;  %896 = vmatprep.subr.bf16.mxu1 %v1825_v54  ;;  %v1773_v9 = vld [vmem:[%s2650_s1 + $0x214] ss:$8 sps:$4 sm:$0xff]   ;;  %v1845_v10 = vld [vmem:[%s2650_s1 + $0x50] ss:$8 sps:$4 sm:$0xff]   ;;  %v1849_v11 = vld [vmem:[%s2650_s1 + $0x64] ss:$8 sps:$4 sm:$0xff]  }
  0x34   :  { %959 = vmatprep.subr.bf16.mxu0 %v1755_v53  ;;  %v1771_v12 = vld [vmem:[%s2650_s1 + $0x210] ss:$8 sps:$4 sm:$0xff]   ;;  %v1776_v13 = vld [vmem:[%s2650_s1 + $0x224] ss:$8 sps:$4 sm:$0xff]   ;;  %v1851_v15 = vld [vmem:[%s2650_s1 + $0x60] ss:$8 sps:$4 sm:$0xff]  }
  0x35   :  { %v1855_v16 = vld [vmem:[%s2650_s1 + $0x74] ss:$8 sps:$4 sm:$0xff]   ;;  %v1774_v17 = vld [vmem:[%s2650_s1 + $0x220] ss:$8 sps:$4 sm:$0xff]   ;;  %v1857_v19 = vld [vmem:[%s2650_s1 + $0x70] ss:$8 sps:$4 sm:$0xff]  }
  0x36   :  { %897 = vmatpush1.bf16.msra.mxu1 %v1827_v56  ;;  %v1779_v18 = vld [vmem:[%s2650_s1 + $0x234] ss:$8 sps:$4 sm:$0xff]   ;;  %v1861_v20 = vld [vmem:[%s2650_s1 + $0x84] ss:$8 sps:$4 sm:$0xff]   ;;  %v1777_v21 = vld [vmem:[%s2650_s1 + $0x230] ss:$8 sps:$4 sm:$0xff]  }
  0x37   :  { %960 = vmatpush1.bf16.msra.mxu0 %v1757_v55  ;;  %898 = vmatprep.subr.bf16.mxu1 %v1831_v58  ;;  %v1782_v22 = vld [vmem:[%s2650_s1 + $0x244] ss:$8 sps:$4 sm:$0xff]   ;;  %v1863_v23 = vld [vmem:[%s2650_s1 + $0x80] ss:$8 sps:$4 sm:$0xff]   ;;  %v1867_v24 = vld [vmem:[%s2650_s1 + $0x94] ss:$8 sps:$4 sm:$0xff]  }
  0x38   :  { %961 = vmatprep.subr.bf16.mxu0 %v1758_v57  ;;  %v1780_v25 = vld [vmem:[%s2650_s1 + $0x240] ss:$8 sps:$4 sm:$0xff]   ;;  %v1785_v26 = vld [vmem:[%s2650_s1 + $0x254] ss:$8 sps:$4 sm:$0xff]   ;;  %v1869_v27 = vld [vmem:[%s2650_s1 + $0x90] ss:$8 sps:$4 sm:$0xff]  }
  0x39   :  { %v1873_v28 = vld [vmem:[%s2650_s1 + $0xa4] ss:$8 sps:$4 sm:$0xff]   ;;  %v1783_v29 = vld [vmem:[%s2650_s1 + $0x250] ss:$8 sps:$4 sm:$0xff]   ;;  %v1875_v31 = vld [vmem:[%s2650_s1 + $0xa0] ss:$8 sps:$4 sm:$0xff]  }
  0x3a   :  { %899 = vmatpush1.bf16.msra.mxu1 %v1833_v61  ;;  %v1788_v30 = vld [vmem:[%s2650_s1 + $0x264] ss:$8 sps:$4 sm:$0xff]   ;;  %v1879_v32 = vld [vmem:[%s2650_s1 + $0xb4] ss:$8 sps:$4 sm:$0xff]   ;;  %v1786_v33 = vld [vmem:[%s2650_s1 + $0x260] ss:$8 sps:$4 sm:$0xff]  }
  0x3b   :  { %962 = vmatpush1.bf16.msra.mxu0 %v1760_v60  ;;  %900 = vmatprep.subr.bf16.mxu1 %v1837_v63  ;;  %v1791_v34 = vld [vmem:[%s2650_s1 + $0x274] ss:$8 sps:$4 sm:$0xff]   ;;  %v1881_v35 = vld [vmem:[%s2650_s1 + $0xb0] ss:$8 sps:$4 sm:$0xff]   ;;  %v1885_v36 = vld [vmem:[%s2650_s1 + $0xc4] ss:$8 sps:$4 sm:$0xff]  }
  0x3c   :  { %963 = vmatprep.subr.bf16.mxu0 %v1761_v62  ;;  %v1789_v37 = vld [vmem:[%s2650_s1 + $0x270] ss:$8 sps:$4 sm:$0xff]   ;;  %v1794_v39 = vld [vmem:[%s2650_s1 + $0x284] ss:$8 sps:$4 sm:$0xff]   ;;  %v1887_v40 = vld [vmem:[%s2650_s1 + $0xc0] ss:$8 sps:$4 sm:$0xff]  }
  0x3d   :  { %v1891_v41 = vld [vmem:[%s2650_s1 + $0xd4] ss:$8 sps:$4 sm:$0xff]   ;;  %v1792_v42 = vld [vmem:[%s2650_s1 + $0x280] ss:$8 sps:$4 sm:$0xff]   ;;  %v1893_v44 = vld [vmem:[%s2650_s1 + $0xd0] ss:$8 sps:$4 sm:$0xff]  }
  0x3e   :  { %901 = vmatpush1.bf16.msra.mxu1 %v1839_v3  ;;  %v1797_v43 = vld [vmem:[%s2650_s1 + $0x294] ss:$8 sps:$4 sm:$0xff]   ;;  %v1897_v45 = vld [vmem:[%s2650_s1 + $0xe4] ss:$8 sps:$4 sm:$0xff]   ;;  %v1795_v46 = vld [vmem:[%s2650_s1 + $0x290] ss:$8 sps:$4 sm:$0xff]  }
  0x3f   :  { %964 = vmatpush1.bf16.msra.mxu0 %v1763_v1  ;;  %902 = vmatprep.subr.bf16.mxu1 %v1843_v5  ;;  %v1800_v47 = vld [vmem:[%s2650_s1 + $0x2a4] ss:$8 sps:$4 sm:$0xff]   ;;  %v1899_v48 = vld [vmem:[%s2650_s1 + $0xe0] ss:$8 sps:$4 sm:$0xff]   ;;  %v1903_v49 = vld [vmem:[%s2650_s1 + $0xf4] ss:$8 sps:$4 sm:$0xff]  }
  0x40   :  { %974 = vmatprep.subr.bf16.mxu0 %v1770_v4  ;;  %v1798_v50 = vld [vmem:[%s2650_s1 + $0x2a0] ss:$8 sps:$4 sm:$0xff]   ;;  %v1803_v51 = vld [vmem:[%s2650_s1 + $0x2b4] ss:$8 sps:$4 sm:$0xff]   ;;  %v1905_v52 = vld [vmem:[%s2650_s1 + $0xf0] ss:$8 sps:$4 sm:$0xff]  }
  0x41   :  { %v1801_v53 = vld [vmem:[%s2650_s1 + $0x2b0] ss:$8 sps:$4 sm:$0xff]   ;;  %v1914_v54 = vld [vmem:[%s2652_s3 + $0x4] ss:$8 sps:$4 sm:$0xff]   ;;  %v1912_v56 = vld [vmem:[%s2652_s3] ss:$8 sps:$4 sm:$0xff]  }
  0x42   :  { %966 = vmatmul.mubr.bf16.vlgmr.msra.gmra.mrb[0].mxu0 %v240_v6  ;;  %903 = vmatpush1.bf16.msra.mxu1 %v1845_v10  ;;  %v1806_v55 = vld [vmem:[%s2650_s1 + $0x2c4] ss:$8 sps:$4 sm:$0xff]   ;;  %v1917_v57 = vld [vmem:[%s2652_s3 + $0x14] ss:$8 sps:$4 sm:$0xff]   ;;  %v1804_v58 = vld [vmem:[%s2650_s1 + $0x2c0] ss:$8 sps:$4 sm:$0xff]  }
  0x43   :  { %975 = vmatpush1.bf16.msra.mxu0 %v1768_v7  ;;  %1006 = vmatprep.mubr.bf16.mxu0 %v2224_v8  ;;  %v1809_v59 = vld [vmem:[%s2650_s1 + $0x2d4] ss:$8 sps:$4 sm:$0xff]   ;;  %v1915_v60 = vld [vmem:[%s2652_s3 + $0x10] ss:$8 sps:$4 sm:$0xff]   ;;  %v1920_v61 = vld [vmem:[%s2652_s3 + $0x24] ss:$8 sps:$4 sm:$0xff]  }
  0x44   :  { %976 = vmatprep.subr.bf16.mxu0 %v1773_v9  ;;  %904 = vmatprep.subr.bf16.mxu1 %v1849_v11  ;;  %v1807_v62 = vld [vmem:[%s2650_s1 + $0x2d0] ss:$8 sps:$4 sm:$0xff]   ;;  %v1812_v63 = vld [vmem:[%s2650_s1 + $0x2e4] ss:$8 sps:$4 sm:$0xff]   ;;  %v1918_v1 = vld [vmem:[%s2652_s3 + $0x20] ss:$8 sps:$4 sm:$0xff]  }
  0x45   :  { %v1810_v2 = vld [vmem:[%s2650_s1 + $0x2e0] ss:$8 sps:$4 sm:$0xff]   ;;  %v1818_v3 = vld [vmem:[%s2650_s1 + $0x2f4] ss:$8 sps:$4 sm:$0xff]   ;;  %v1921_v4 = vld [vmem:[%s2652_s3 + $0x30] ss:$8 sps:$4 sm:$0xff]  }
  0x46   :  { %905 = vmatpush1.bf16.msra.mxu1 %v1851_v15  ;;  %v1926_v5 = vld [vmem:[%s2652_s3 + $0x44] ss:$8 sps:$4 sm:$0xff]   ;;  %v1816_v6 = vld [vmem:[%s2650_s1 + $0x2f0] ss:$8 sps:$4 sm:$0xff]   ;;  %v1924_v9 = vld [vmem:[%s2652_s3 + $0x40] ss:$8 sps:$4 sm:$0xff]  }
  0x47   :  { %977 = vmatpush1.bf16.msra.mxu0 %v1771_v12  ;;  %906 = vmatprep.subr.bf16.mxu1 %v1855_v16  ;;  %v1824_v7 = vld [vmem:[%s2650_s1 + $0x304] ss:$8 sps:$4 sm:$0xff]   ;;  %v1929_v10 = vld [vmem:[%s2652_s3 + $0x54] ss:$8 sps:$4 sm:$0xff]   ;;  %v1822_v11 = vld [vmem:[%s2650_s1 + $0x300] ss:$8 sps:$4 sm:$0xff]   ;;  %v243_v12 = vcombine.high %v2224_v8, %v2224_v8 }
  0x48   :  { %978 = vmatprep.subr.bf16.mxu0 %v1776_v13  ;;  %v1830_v13 = vld [vmem:[%s2650_s1 + $0x314] ss:$8 sps:$4 sm:$0xff]   ;;  %v1927_v15 = vld [vmem:[%s2652_s3 + $0x50] ss:$8 sps:$4 sm:$0xff]   ;;  %v1932_v16 = vld [vmem:[%s2652_s3 + $0x64] ss:$8 sps:$4 sm:$0xff]  }
  0x49   :  { %v1828_v8 = vld [vmem:[%s2650_s1 + $0x310] ss:$8 sps:$4 sm:$0xff]  }
  0x4a   :  { %907 = vmatpush1.bf16.msra.mxu1 %v1857_v19  ;;  %v1935_v19 = vld [vmem:[%s2652_s3 + $0x74] ss:$8 sps:$4 sm:$0xff]  }
  0x4b   :  { %979 = vmatpush1.bf16.msra.mxu0 %v1774_v17  ;;  %908 = vmatprep.subr.bf16.mxu1 %v1861_v20  ;;  %v1836_v17 = vld [vmem:[%s2650_s1 + $0x324] ss:$8 sps:$4 sm:$0xff]   ;;  %v1834_v20 = vld [vmem:[%s2650_s1 + $0x320] ss:$8 sps:$4 sm:$0xff]  }
  0x4c   :  { %980 = vmatprep.subr.bf16.mxu0 %v1779_v18  ;;  %v1930_v18 = vld [vmem:[%s2652_s3 + $0x60] ss:$8 sps:$4 sm:$0xff]  }
  0x4e   :  { %909 = vmatpush1.bf16.msra.mxu1 %v1863_v23  ;;  %v1938_v23 = vld [vmem:[%s2652_s3 + $0x84] ss:$8 sps:$4 sm:$0xff]  }
  0x4f   :  { %981 = vmatpush1.bf16.msra.mxu0 %v1777_v21  ;;  %910 = vmatprep.subr.bf16.mxu1 %v1867_v24  ;;  %v1842_v21 = vld [vmem:[%s2650_s1 + $0x334] ss:$8 sps:$4 sm:$0xff]   ;;  %v1840_v24 = vld [vmem:[%s2650_s1 + $0x330] ss:$8 sps:$4 sm:$0xff]  }
  0x50   :  { %982 = vmatprep.subr.bf16.mxu0 %v1782_v22  ;;  %v1933_v22 = vld [vmem:[%s2652_s3 + $0x70] ss:$8 sps:$4 sm:$0xff]  }
  0x52   :  { %911 = vmatpush1.bf16.msra.mxu1 %v1869_v27  ;;  %v1941_v27 = vld [vmem:[%s2652_s3 + $0x94] ss:$8 sps:$4 sm:$0xff]  }
  0x53   :  { %983 = vmatpush1.bf16.msra.mxu0 %v1780_v25  ;;  %912 = vmatprep.subr.bf16.mxu1 %v1873_v28  ;;  %v1848_v25 = vld [vmem:[%s2650_s1 + $0x344] ss:$8 sps:$4 sm:$0xff]   ;;  %v1846_v28 = vld [vmem:[%s2650_s1 + $0x340] ss:$8 sps:$4 sm:$0xff]  }
  0x54   :  { %984 = vmatprep.subr.bf16.mxu0 %v1785_v26  ;;  %v1936_v26 = vld [vmem:[%s2652_s3 + $0x80] ss:$8 sps:$4 sm:$0xff]  }
  0x56   :  { %913 = vmatpush1.bf16.msra.mxu1 %v1875_v31  ;;  %v1944_v31 = vld [vmem:[%s2652_s3 + $0xa4] ss:$8 sps:$4 sm:$0xff]  }
  0x57   :  { %985 = vmatpush1.bf16.msra.mxu0 %v1783_v29  ;;  %914 = vmatprep.subr.bf16.mxu1 %v1879_v32  ;;  %v1854_v29 = vld [vmem:[%s2650_s1 + $0x354] ss:$8 sps:$4 sm:$0xff]   ;;  %v1852_v32 = vld [vmem:[%s2650_s1 + $0x350] ss:$8 sps:$4 sm:$0xff]  }
  0x58   :  { %986 = vmatprep.subr.bf16.mxu0 %v1788_v30  ;;  %v1939_v30 = vld [vmem:[%s2652_s3 + $0x90] ss:$8 sps:$4 sm:$0xff]  }
  0x5a   :  { %915 = vmatpush1.bf16.msra.mxu1 %v1881_v35  ;;  %v1947_v35 = vld [vmem:[%s2652_s3 + $0xb4] ss:$8 sps:$4 sm:$0xff]  }
  0x5b   :  { %987 = vmatpush1.bf16.msra.mxu0 %v1786_v33  ;;  %916 = vmatprep.subr.bf16.mxu1 %v1885_v36  ;;  %v1860_v33 = vld [vmem:[%s2650_s1 + $0x364] ss:$8 sps:$4 sm:$0xff]   ;;  %v1858_v36 = vld [vmem:[%s2650_s1 + $0x360] ss:$8 sps:$4 sm:$0xff]  }
  0x5c   :  { %988 = vmatprep.subr.bf16.mxu0 %v1791_v34  ;;  %v1942_v34 = vld [vmem:[%s2652_s3 + $0xa0] ss:$8 sps:$4 sm:$0xff]  }
  0x5e   :  { %917 = vmatpush1.bf16.msra.mxu1 %v1887_v40  ;;  %v1950_v40 = vld [vmem:[%s2652_s3 + $0xc4] ss:$8 sps:$4 sm:$0xff]  }
  0x5f   :  { %989 = vmatpush1.bf16.msra.mxu0 %v1789_v37  ;;  %918 = vmatprep.subr.bf16.mxu1 %v1891_v41  ;;  %v1866_v37 = vld [vmem:[%s2650_s1 + $0x374] ss:$8 sps:$4 sm:$0xff]   ;;  %v1864_v41 = vld [vmem:[%s2650_s1 + $0x370] ss:$8 sps:$4 sm:$0xff]  }
  0x60   :  { %990 = vmatprep.subr.bf16.mxu0 %v1794_v39  ;;  %v1945_v39 = vld [vmem:[%s2652_s3 + $0xb0] ss:$8 sps:$4 sm:$0xff]  }
  0x62   :  { %919 = vmatpush1.bf16.msra.mxu1 %v1893_v44  ;;  %v1870_v44 = vld [vmem:[%s2650_s1 + $0x380] ss:$8 sps:$4 sm:$0xff]  }
  0x63   :  { %991 = vmatpush1.bf16.msra.mxu0 %v1792_v42  ;;  %920 = vmatprep.subr.bf16.mxu1 %v1897_v45  ;;  %v1872_v42 = vld [vmem:[%s2650_s1 + $0x384] ss:$8 sps:$4 sm:$0xff]   ;;  %v1878_v45 = vld [vmem:[%s2650_s1 + $0x394] ss:$8 sps:$4 sm:$0xff]  }
  0x64   :  { %992 = vmatprep.subr.bf16.mxu0 %v1797_v43  ;;  %v1948_v43 = vld [vmem:[%s2652_s3 + $0xc0] ss:$8 sps:$4 sm:$0xff]  }
  0x66   :  { %921 = vmatpush1.bf16.msra.mxu1 %v1899_v48  ;;  %v1882_v48 = vld [vmem:[%s2650_s1 + $0x3a0] ss:$8 sps:$4 sm:$0xff]  }
  0x67   :  { %993 = vmatpush1.bf16.msra.mxu0 %v1795_v46  ;;  %922 = vmatprep.subr.bf16.mxu1 %v1903_v49  ;;  %v1876_v46 = vld [vmem:[%s2650_s1 + $0x390] ss:$8 sps:$4 sm:$0xff]   ;;  %v1890_v49 = vld [vmem:[%s2650_s1 + $0x3b4] ss:$8 sps:$4 sm:$0xff]  }
  0x68   :  { %994 = vmatprep.subr.bf16.mxu0 %v1800_v47  ;;  %v1884_v47 = vld [vmem:[%s2650_s1 + $0x3a4] ss:$8 sps:$4 sm:$0xff]  }
  0x6a   :  { %923 = vmatpush1.bf16.msra.mxu1 %v1905_v52  ;;  %v1894_v52 = vld [vmem:[%s2650_s1 + $0x3c0] ss:$8 sps:$4 sm:$0xff]  }
  0x6b   :  { %995 = vmatpush1.bf16.msra.mxu0 %v1798_v50  ;;  %1264 = vmatprep.subr.bf16.mxu1 %v1914_v54  ;;  %v1888_v50 = vld [vmem:[%s2650_s1 + $0x3b0] ss:$8 sps:$4 sm:$0xff]  }
  0x6c   :  { %996 = vmatprep.subr.bf16.mxu0 %v1803_v51  ;;  %v1896_v51 = vld [vmem:[%s2650_s1 + $0x3c4] ss:$8 sps:$4 sm:$0xff]   ;;  %v1900_v54 = vld [vmem:[%s2650_s1 + $0x3d0] ss:$8 sps:$4 sm:$0xff]  }
  0x6d   :  { %925 = vmatmul.mubr.bf16.vlgmr.msra.gmra.mrb[0].mxu1 %v2202_v0  ;;  %v1923_v0 = vld [vmem:[%s2652_s3 + $0x34] ss:$8 sps:$4 sm:$0xff]  }
  0x6e   :  { %1265 = vmatpush1.bf16.msra.mxu1 %v1912_v56  ;;  %v1906_v56 = vld [vmem:[%s2650_s1 + $0x3e0] ss:$8 sps:$4 sm:$0xff]  }
  0x6f   :  { %997 = vmatpush1.bf16.msra.mxu0 %v1801_v53  ;;  %1266 = vmatprep.subr.bf16.mxu1 %v1917_v57  ;;  %v1902_v53 = vld [vmem:[%s2650_s1 + $0x3d4] ss:$8 sps:$4 sm:$0xff]  }
  0x70   :  { %998 = vmatprep.subr.bf16.mxu0 %v1806_v55  ;;  %v1908_v55 = vld [vmem:[%s2650_s1 + $0x3e4] ss:$8 sps:$4 sm:$0xff]   ;;  %v1911_v57 = vld [vmem:[%s2650_s1 + $0x3f4] ss:$8 sps:$4 sm:$0xff]  }
  0x72   :  { %1267 = vmatpush1.bf16.msra.mxu1 %v1915_v60  ;;  %v1951_v60 = vld [vmem:[%s2652_s3 + $0xd0] ss:$8 sps:$4 sm:$0xff]  }
  0x73   :  { %999 = vmatpush1.bf16.msra.mxu0 %v1804_v58  ;;  %1268 = vmatprep.subr.bf16.mxu1 %v1920_v61  ;;  %v1909_v58 = vld [vmem:[%s2650_s1 + $0x3f0] ss:$8 sps:$4 sm:$0xff]   ;;  %v1953_v61 = vld [vmem:[%s2652_s3 + $0xd4] ss:$8 sps:$4 sm:$0xff]  }
  0x74   :  { %1000 = vmatprep.subr.bf16.mxu0 %v1809_v59  ;;  %v241_v59 = vcombine.high %v2130_v38, %v2130_v38 }
  0x76   :  { %1269 = vmatpush1.bf16.msra.mxu1 %v1918_v1  ;;  %v1957_v1 = vld [vmem:[%s2652_s3 + $0xf0] ss:$8 sps:$4 sm:$0xff]  }
  0x77   :  { %1001 = vmatpush1.bf16.msra.mxu0 %v1807_v62  ;;  %1270 = vmatprep.subr.bf16.mxu1 %v1923_v0  ;;  %v1956_v62 = vld [vmem:[%s2652_s3 + $0xe4] ss:$8 sps:$4 sm:$0xff]  }
  0x78   :  { %1002 = vmatprep.subr.bf16.mxu0 %v1812_v63  ;;  %v1959_v63 = vld [vmem:[%s2652_s3 + $0xf4] ss:$8 sps:$4 sm:$0xff]   ;;  %v1960_v0 = vld [vmem:[%s2654_s5 + $0x40] sm:$0xff]  }
  0x7a   :  { %1271 = vmatpush1.bf16.msra.mxu1 %v1921_v4 }
  0x7b   :  { %1003 = vmatpush1.bf16.msra.mxu0 %v1810_v2  ;;  %1272 = vmatprep.subr.bf16.mxu1 %v1926_v5 }
  0x7c   :  { %1004 = vmatprep.subr.bf16.mxu0 %v1818_v3 }
  0x7e   :  { %1273 = vmatpush1.bf16.msra.mxu1 %v1924_v9  ;;  %v168_v9 = vsub.s32 1, %v2077_v14 }
  0x7f   :  { %1005 = vmatpush1.bf16.msra.mxu0 %v1816_v6  ;;  %1274 = vmatprep.subr.bf16.mxu1 %v1929_v10  ;;  %v164_v6 = vsub.s32 0, %v2077_v14  ;;  %v1962_v14 = vld [vmem:[%s2654_s5 + $0x48] sm:$0xff]  }
  0x80   :  { %1015 = vmatprep.subr.bf16.mxu0 %v1824_v7  ;;  %v160_v7 = vld [vmem:[%s2651_s2] sm:$0x3] }
  0x81   :  { %v165_v10 = vrot.slane %v160_v7, %v164_v6 }
  0x82   :  { %1007 = vmatmul.mubr.bf16.vlgmr.msra.gmra.mrb[0].mxu0 %v2130_v38  ;;  %1275 = vmatpush1.bf16.msra.mxu1 %v1927_v15  ;;  %v1954_v38 = vld [vmem:[%s2652_s3 + $0xe0] ss:$8 sps:$4 sm:$0xff]  }
  0x83   :  { %1016 = vmatpush1.bf16.msra.mxu0 %v1822_v11  ;;  %1047 = vmatprep.mubr.bf16.mxu0 %v243_v12  ;;  %v169_v11 = vrot.slane %v160_v7, %v168_v9 }
  0x84   :  { %1017 = vmatprep.subr.bf16.mxu0 %v1830_v13  ;;  %1276 = vmatprep.subr.bf16.mxu1 %v1932_v16 }
  0x86   :  { %1277 = vmatpush1.bf16.msra.mxu1 %v1930_v18 }
  0x87   :  { %1018 = vmatpush1.bf16.msra.mxu0 %v1828_v8  ;;  %1278 = vmatprep.subr.bf16.mxu1 %v1935_v19 }
  0x88   :  { %1019 = vmatprep.subr.bf16.mxu0 %v1836_v17 }
  0x8a   :  { %1279 = vmatpush1.bf16.msra.mxu1 %v1933_v22 }
  0x8b   :  { %1020 = vmatpush1.bf16.msra.mxu0 %v1834_v20  ;;  %1280 = vmatprep.subr.bf16.mxu1 %v1938_v23  ;;  %v1961_v23 = vld [vmem:[%s2654_s5] sm:$0xff]  }
  0x8c   :  { %1021 = vmatprep.subr.bf16.mxu0 %v1842_v21 }
  0x8e   :  { %1281 = vmatpush1.bf16.msra.mxu1 %v1936_v26  ;;  %v1964_v26 = vld [vmem:[%s2654_s5 + $0x50] sm:$0xff]  }
  0x8f   :  { %1022 = vmatpush1.bf16.msra.mxu0 %v1840_v24  ;;  %1282 = vmatprep.subr.bf16.mxu1 %v1941_v27  ;;  %v1965_v27 = vld [vmem:[%s2654_s5 + $0x10] sm:$0xff]  }
  0x90   :  { %1023 = vmatprep.subr.bf16.mxu0 %v1848_v25  ;;  %v1963_v25 = vld [vmem:[%s2654_s5 + $0x8] sm:$0xff]  }
  0x92   :  { %1283 = vmatpush1.bf16.msra.mxu1 %v1939_v30  ;;  %v1968_v30 = vld [vmem:[%s2654_s5 + $0x60] sm:$0xff]  }
  0x93   :  { %1024 = vmatpush1.bf16.msra.mxu0 %v1846_v28  ;;  %1284 = vmatprep.subr.bf16.mxu1 %v1944_v31  ;;  %v1966_v28 = vld [vmem:[%s2654_s5 + $0x58] sm:$0xff]   ;;  %v1969_v31 = vld [vmem:[%s2654_s5 + $0x20] sm:$0xff]  }
  0x94   :  { %1025 = vmatprep.subr.bf16.mxu0 %v1854_v29  ;;  %v1967_v29 = vld [vmem:[%s2654_s5 + $0x18] sm:$0xff]  }
  0x96   :  { %1285 = vmatpush1.bf16.msra.mxu1 %v1942_v34  ;;  %v1972_v34 = vld [vmem:[%s2654_s5 + $0x70] sm:$0xff]  }
  0x97   :  { %1026 = vmatpush1.bf16.msra.mxu0 %v1852_v32  ;;  %1286 = vmatprep.subr.bf16.mxu1 %v1947_v35  ;;  %v1970_v32 = vld [vmem:[%s2654_s5 + $0x68] sm:$0xff]   ;;  %v1973_v35 = vld [vmem:[%s2654_s5 + $0x30] sm:$0xff]  }
  0x98   :  { %1027 = vmatprep.subr.bf16.mxu0 %v1860_v33  ;;  %v1971_v33 = vld [vmem:[%s2654_s5 + $0x28] sm:$0xff]  }
  0x9a   :  { %1287 = vmatpush1.bf16.msra.mxu1 %v1945_v39  ;;  %v1090_v39 = vld [vmem:[%s2653_s4] sm:$0x3] }
  0x9b   :  { %1028 = vmatpush1.bf16.msra.mxu0 %v1858_v36  ;;  %1288 = vmatprep.subr.bf16.mxu1 %v1950_v40  ;;  %v1974_v36 = vld [vmem:[%s2654_s5 + $0x78] sm:$0xff]   ;;  %v1097_v40 = vrot.slane %v1090_v39, %v164_v6 }
  0x9c   :  { %1029 = vmatprep.subr.bf16.mxu0 %v1866_v37  ;;  %v1975_v37 = vld [vmem:[%s2654_s5 + $0x38] sm:$0xff]  }
  0x9e   :  { %1289 = vmatpush1.bf16.msra.mxu1 %v1948_v43 }
  0x9f   :  { %1030 = vmatpush1.bf16.msra.mxu0 %v1864_v41  ;;  %1290 = vmatprep.subr.bf16.mxu1 %v1953_v61  ;;  %v1101_v41 = vrot.slane %v1090_v39, %v168_v9 }
  0xa0   :  { %1031 = vmatprep.subr.bf16.mxu0 %v1872_v42 }
  0xa2   :  { %1291 = vmatpush1.bf16.msra.mxu1 %v1951_v60 }
  0xa3   :  { %1032 = vmatpush1.bf16.msra.mxu0 %v1870_v44  ;;  %1292 = vmatprep.subr.bf16.mxu1 %v1956_v62 }
  0xa4   :  { %1033 = vmatprep.subr.bf16.mxu0 %v1878_v45 }
  0xa6   :  { %1293 = vmatpush1.bf16.msra.mxu1 %v1954_v38 }
  0xa7   :  { %1034 = vmatpush1.bf16.msra.mxu0 %v1876_v46  ;;  %1294 = vmatprep.subr.bf16.mxu1 %v1959_v63 }
  0xa8   :  { %1035 = vmatprep.subr.bf16.mxu0 %v1884_v47 }
  0xaa   :  { %1295 = vmatpush1.bf16.msra.mxu1 %v1957_v1 }
  0xab   :  { %1036 = vmatpush1.bf16.msra.mxu0 %v1882_v48  ;;  %1678 = vmatprep.subr.bf16.mxu1 %v1960_v0 }
  0xac   :  { %1037 = vmatprep.subr.bf16.mxu0 %v1890_v49 }
  0xaf   :  { %1038 = vmatpush1.bf16.msra.mxu0 %v1888_v50 }
  0xb0   :  { %1039 = vmatprep.subr.bf16.mxu0 %v1896_v51 }
  0xb3   :  { %1040 = vmatpush1.bf16.msra.mxu0 %v1894_v52 }
  0xb4   :  { %1041 = vmatprep.subr.bf16.mxu0 %v1902_v53  ;;  %v1661_v53 = vld [vmem:[%s2655_s6] ss:$0 sm:$0xff] }
  0xb7   :  { %1042 = vmatpush1.bf16.msra.mxu0 %v1900_v54 }
  0xb8   :  { %1043 = vmatprep.subr.bf16.mxu0 %v1908_v55 }
  0xbb   :  { %1044 = vmatpush1.bf16.msra.mxu0 %v1906_v56 }
  0xbc   :  { %1045 = vmatprep.subr.bf16.mxu0 %v1911_v57 }
  0xbf   :  { %1046 = vmatpush1.bf16.msra.mxu0 %v1909_v58 }
  0xc2   :  { %1048 = vmatmul.mubr.bf16.vlgmr.msra.gmra.mrb[0].mxu0 %v241_v59 }
 0x140   :  { %v926_v2 = vpop.f32.mrb[0].mxu1 }
 0x141   :  { %v928_v3 = vpop.f32.mrb[1].mxu1  ;;  %v927_v12 = vadd.f32 %v926_v2, %v165_v10 }
 0x142   :  { %v930_v4 = vpop.f32.mrb[2].mxu1  ;;  %v929_v13 = vadd.f32 %v928_v3, %v169_v11 }
 0x143   :  { %v931_v5 = vpop.f32.mrb[3].mxu1 }
 0x195   :  { %v1049_v15 = vpop.f32.mrb[0].mxu0 }
 0x196   :  { %v1701_v16 = vadd.f32 %v1049_v15, %v927_v12  ;;  %v1051_v8 = vpop.f32.mrb[1].mxu0 }
 0x197   :  { %v1703_v17 = vadd.f32 %v1051_v8, %v929_v13  ;;  %v1053_v18 = vpop.f32.mrb[2].mxu0 }
 0x198   :  { %v1056_v19 = vmax.f32 %v1701_v16, 0.0  ;;  %v1054_v20 = vpop.f32.mrb[3].mxu0 }
 0x199   :  { %v1057_v21 = vmax.f32 %v1703_v17, 0.0 }
 0x19a   :  { %v1091_v24 = vpack.c.bf16 %v1056_v19, %v1056_v19 }
 0x19b   :  { %v1092_v22 = vpack.c.bf16 %v1057_v21, %v1057_v21 }
 0x19d   :  { %1296 = vmatprep.mubr.bf16.mxu1 %v1092_v22 }
 0x19e   :  { %1297 = vmatmul.mubr.bf16.vlgmr.msra.gmra.mrb[4].mxu1 %v1091_v24 }
 0x19f   :  { %1679 = vmatpush3.bf16.msra.mxu1 %v1961_v23 }
 0x1a0   :  { %1680 = vmatprep.subr.bf16.mxu1 %v1962_v14 }
 0x1a3   :  { %1681 = vmatpush3.bf16.msra.mxu1 %v1963_v25 }
 0x1a4   :  { %1682 = vmatprep.subr.bf16.mxu1 %v1964_v26 }
 0x1a7   :  { %1683 = vmatpush3.bf16.msra.mxu1 %v1965_v27 }
 0x1a8   :  { %1684 = vmatprep.subr.bf16.mxu1 %v1966_v28 }
 0x1ab   :  { %1685 = vmatpush3.bf16.msra.mxu1 %v1967_v29 }
 0x1ac   :  { %1686 = vmatprep.subr.bf16.mxu1 %v1968_v30 }
 0x1af   :  { %1687 = vmatpush3.bf16.msra.mxu1 %v1969_v31 }
 0x1b0   :  { %1688 = vmatprep.subr.bf16.mxu1 %v1970_v32 }
 0x1b3   :  { %1689 = vmatpush3.bf16.msra.mxu1 %v1971_v33 }
 0x1b4   :  { %1690 = vmatprep.subr.bf16.mxu1 %v1972_v34 }
 0x1b7   :  { %1691 = vmatpush3.bf16.msra.mxu1 %v1973_v35 }
 0x1b8   :  { %1692 = vmatprep.subr.bf16.mxu1 %v1974_v36 }
 0x1bb   :  { %1693 = vmatpush3.bf16.msra.mxu1 %v1975_v37 }
 0x271   :  { %v1298_v42 = vpop.f32.mrb[4].mxu1 }
 0x272   :  { %v1299_v43 = vadd.f32 %v1298_v42, %v1097_v40  ;;  %v1300_v44 = vpop.f32.mrb[5].mxu1 }
 0x273   :  { %v1301_v45 = vadd.f32 %v1300_v44, %v1101_v41  ;;  %v1302_v46 = vpop.f32.mrb[6].mxu1 }
 0x274   :  { %v1305_v47 = vmax.f32 %v1299_v43, 0.0  ;;  %v1303_v48 = vpop.f32.mrb[7].mxu1 }
 0x275   :  { %v1306_v49 = vmax.f32 %v1301_v45, 0.0 }
 0x276   :  { %v1340_v51 = vpack.c.bf16 %v1305_v47, %v1305_v47 }
 0x277   :  { %v1341_v50 = vpack.c.bf16 %v1306_v49, %v1306_v49 }
 0x279   :  { %1476 = vmatprep.mubr.bf16.mxu1 %v1341_v50 }
 0x27a   :  { %1477 = vmatmul.mubr.bf16.vlgmr.msra.gmra.mrb[8].mxu1 %v1340_v51 }
 0x34d   :  { %v1694_v52 = vpop.f32.mrb[8].mxu1 }
 0x34e   :  { %v1695_v54 = vpop.f32.mrb[9].mxu1 }
 0x34f   :  { %v1696_v55 = vadd.f32 %v1695_v54, %v1694_v52  ;;  %v1697_v56 = vpop.f32.mrb[10].mxu1 }
 0x350   :  { %v1698_v57 = vpop.f32.mrb[11].mxu1 }
 0x351   :  { %v1479_v58 = vadd.f32 %v1696_v55, %v1661_v53 }
 0x353   :  { %1484 = vst [vmem:[#allocation2] sm:$0xff] %v1479_v58 }
 0x354   :  { %1489 = vsyncadd [#allocation3], 96  ;;  %s2001_s4 = smov [#allocation2]  }
 0x355   :  { %s1490_s28 = sshll.u32 %s2001_s4, 4  ;;  %s1491_s28 = int_to_ptr.vmem [resolvable:$true] %s1490_s28 }
 0x356   :  { %s1976_s29 = scalar_lea.vmem %s1491_s28, 32  ;;  %s1980_s30 = scalar_lea.vmem %s1491_s28, 128 }
 0x357   :  { %p1977_p0 = scmp.ne.s32.totalorder %s1491_s28, %s1976_s29  ;;  %p1981_p1 = scmp.lt.s32.totalorder %s1491_s28, %s1491_s28 }
 0x358   :  { %p1982_p2 = scmp.lt.s32.totalorder %s1980_s30, %s1976_s29 }
 0x35a   :  { %p1983_p3 = por %p1982_p2, %p1981_p1 }
 0x35c   :  { %p1984_p4 = pnand %p1983_p3, %p1977_p0 }
 0x35e   :  { %1987 = shalt.err (!%p1984_p4)
}
 0x35f   :  { %s1988_s9 = scalar_lea.hbm %s2656_s7, 32 }
 0x360   :  { %p1989_p5 = scmp.ne.s32.totalorder %s2656_s7, %s1988_s9  ;;  %p1992_p6 = scmp.lt.u32.totalorder %s1988_s9, %s2656_s7 }
 0x362   :  { %p1994_p7 = pnand %p1992_p6, %p1989_p5 }
 0x364   :  { %1997 = shalt.err (!%p1994_p7)
}
 0x365   :  { %s2002_s14 = smov 32   ;;  %s2003_s15 = smov 2  }
 0x366   :  { %1496 = dma.vmem_to_hbm [thread:$0]  %s1491_s28, 32, %s2656_s7, [#allocation3], %s2002_s14, %s2002_s14, %s2003_s15  }
 0x367   :  { %1998 = dma.done.wait [#allocation3], 128  }
 0x368   :  { %1999 = vsyncadd [#allocation3], 4294967168 }
 0x369   :  { %1500 = vsyncpa [#allocation3], 1 }

</bundles_post_ra>
